<compile_context>
chip_gen: v5e
topology: v5e:2x2
jax: 0.10.0
libtpu: 0.0.40
codegen_flags: <defaults>
</compile_context>

<pallas_src>
import functools

import jax
import jax.numpy as jnp
from jax.experimental import pallas as pl
from jax.experimental.pallas import tpu as pltpu


def _round_up(x, m):
    return ((x + m - 1) // m) * m


def _layer_norm(x, gamma, beta, eps):
    """PyTorch nn.LayerNorm semantics (biased var, eps inside sqrt), f32 stats.

    One-pass form: sum(x) and sum(x*x) issue back-to-back on the XLU.
    gamma/beta may be pre-scaled by the caller (the 0.5 average is folded in).
    """
    h = x.shape[-1]
    s1 = jnp.sum(x, axis=-1, keepdims=True)
    s2 = jnp.sum(x * x, axis=-1, keepdims=True)
    mean = s1 * (1.0 / h)
    var = jnp.maximum(s2 * (1.0 / h) - mean * mean, 0.0)  # guard cancellation
    inv = jax.lax.rsqrt(var + eps)
    return (x - mean) * (inv * gamma) + beta


def visual_feat_encoder_kernel(
    feats_ref,   # (TM, feat_dim)   native dtype; cast to bf16 in-kernel
    boxes_ref,   # (TM, pos_dim)
    wv_ref,      # (feat_dim, hidden) bf16
    wb_ref,      # (pos_dim, hidden)  f32
    p_ref,       # (8, hidden) f32: [bv, g_v/2, b_v/2, bb, g_b/2, b_b/2, 0, 0]
    out_ref,     # (TM, hidden)
    *,
    eps,
):
    # --- visn_fc: bf16 MXU inputs, f32 accumulation.  The in-kernel cast is a
    # cheap VPU op hidden under the matmul/DMA; it replaces a full wrapper-side
    # HBM round trip over feats.
    a = feats_ref[...].astype(jnp.bfloat16)
    x = jnp.dot(a, wv_ref[...], preferred_element_type=jnp.float32)
    x = x + p_ref[0:1, :]
    x = _layer_norm(x, p_ref[1:2, :], p_ref[2:3, :], eps)

    # --- box_fc: K = pos_dim is tiny (4), keep it as an exact f32 broadcast
    # sum on the VPU; it hides under the feats matmul / HBM DMA.
    boxes = boxes_ref[...].astype(jnp.float32)
    pos_dim = boxes.shape[1]
    y = boxes[:, 0:1] * wb_ref[0:1, :] + p_ref[3:4, :]
    for k in range(1, pos_dim):
        y = y + boxes[:, k:k + 1] * wb_ref[k:k + 1, :]
    y = _layer_norm(y, p_ref[4:5, :], p_ref[5:6, :], eps)

    # (x + y) / 2 : the 0.5 is already folded into gamma/beta.
    # Dropout(p=0.0) is identity.
    out_ref[...] = (x + y).astype(out_ref.dtype)


def visual_feat_encoder(feats, boxes, params, *, tile_m=512, eps=1e-9,
                        out_dtype=jnp.bfloat16):
    """feats: (B, N, feat_dim), boxes: (B, N, pos_dim) -> (B, N, hidden)."""
    B, N, feat_dim = feats.shape
    _, _, pos_dim = boxes.shape
    hidden = params["wv"].shape[1]
    M = B * N

    # Pure reshapes: no cast, no pad, no copy.  Boundary tiles are handled by
    # Pallas (clamped read, masked store); all math is strictly row-wise.
    feats2d = feats.reshape(M, feat_dim)
    boxes2d = boxes.reshape(M, pos_dim)

    # tile_m: multiple of 8 (sublane); capped so small inputs still give >= 2
    # grid steps (so the "parallel" axis can split across both v7x TCs).
    tile_m = _round_up(max(tile_m, 8), 8)
    tile_m = min(tile_m, max(8, _round_up(pl.cdiv(M, 2), 8)))
    grid_m = pl.cdiv(M, tile_m)

    # One-time parameter-side precompute: MXU-dtype weights, packed bias /
    # LayerNorm params (single DMA block), with the final 0.5 folded in.
    wv = params["wv"].astype(jnp.bfloat16)             # (feat_dim, hidden)
    wb = params["wb"].astype(jnp.float32)               # (pos_dim, hidden)
    packed = jnp.concatenate(
        [jnp.stack([params["bv"],
                    0.5 * params["gamma_v"], 0.5 * params["beta_v"],
                    params["bb"],
                    0.5 * params["gamma_b"], 0.5 * params["beta_b"]],
                   axis=0).astype(jnp.float32),
         jnp.zeros((2, hidden), jnp.float32)],
        axis=0)                                          # (8, hidden)

    # Right-sized VMEM budget: double-buffered activation tiles + weight blocks
    # (default double-buffered too, they stay resident) + f32 temporaries.
    out_itemsize = jnp.dtype(out_dtype).itemsize
    tile_bytes = tile_m * (feat_dim * feats2d.dtype.itemsize
                           + pos_dim * boxes2d.dtype.itemsize
                           + hidden * out_itemsize)
    weight_bytes = (wv.size * wv.dtype.itemsize + wb.size * 4 + packed.size * 4)
    temp_bytes = 6 * tile_m * hidden * 4
    vmem_limit = int(min(40 * 2**20,
                         max(16 * 2**20,
                             2 * tile_bytes + 2 * weight_bytes + temp_bytes
                             + 2 * 2**20)))

    out2d = pl.pallas_call(
        functools.partial(visual_feat_encoder_kernel, eps=eps),
        out_shape=jax.ShapeDtypeStruct((M, hidden), out_dtype),
        grid_spec=pl.GridSpec(
            grid=(grid_m,),
            in_specs=[
                pl.BlockSpec((tile_m, feat_dim), lambda i: (i, 0)),   # feats
                pl.BlockSpec((tile_m, pos_dim), lambda i: (i, 0)),    # boxes
                pl.BlockSpec((feat_dim, hidden), lambda i: (0, 0)),   # Wv (revisited)
                pl.BlockSpec((pos_dim, hidden), lambda i: (0, 0)),    # Wb (revisited)
                pl.BlockSpec((8, hidden), lambda i: (0, 0)),          # packed params
            ],
            out_specs=pl.BlockSpec((tile_m, hidden), lambda i: (i, 0)),
        ),
        compiler_params=pltpu.CompilerParams(
            dimension_semantics=("parallel",),
            vmem_limit_bytes=vmem_limit,
        ),
    )(feats2d, boxes2d, wv, wb, packed)

    return out2d.reshape(B, N, hidden)


def reference(feats, boxes, params, eps=1e-9):
    x = feats @ params["wv"] + params["bv"]
    mx = x.mean(-1, keepdims=True)
    vx = ((x - mx) ** 2).mean(-1, keepdims=True)
    x = (x - mx) / jnp.sqrt(vx + eps) * params["gamma_v"] + params["beta_v"]
    y = boxes @ params["wb"] + params["bb"]
    my = y.mean(-1, keepdims=True)
    vy = ((y - my) ** 2).mean(-1, keepdims=True)
    y = (y - my) / jnp.sqrt(vy + eps) * params["gamma_b"] + params["beta_b"]
    return (x + y) / 2


if __name__ == "__main__":
    # Small shapes consistent with the module's forward:
    # feats: (B, N, visual_feat_dim), boxes: (B, N, visual_pos_dim)
    B, N = 2, 8
    visual_feat_dim, visual_pos_dim, hidden_size = 16, 4, 32

    key = jax.random.PRNGKey(0)
    k_f, k_b, k_wv, k_bv, k_wb, k_bb = jax.random.split(key, 6)

    feats = jax.random.normal(k_f, (B, N, visual_feat_dim), dtype=jnp.float32)
    boxes = jax.random.normal(k_b, (B, N, visual_pos_dim), dtype=jnp.float32)

    params = {
        # Stored as (in_dim, hidden) == transpose of torch's Linear.weight
        "wv": jax.random.normal(k_wv, (visual_feat_dim, hidden_size),
                                dtype=jnp.float32) * 0.05,
        "bv": jax.random.normal(k_bv, (hidden_size,), dtype=jnp.float32) * 0.05,
        "gamma_v": jnp.ones((hidden_size,), jnp.float32),
        "beta_v": jnp.zeros((hidden_size,), jnp.float32),
        "wb": jax.random.normal(k_wb, (visual_pos_dim, hidden_size),
                                dtype=jnp.float32) * 0.05,
        "bb": jax.random.normal(k_bb, (hidden_size,), dtype=jnp.float32) * 0.05,
        "gamma_b": jnp.ones((hidden_size,), jnp.float32),
        "beta_b": jnp.zeros((hidden_size,), jnp.float32),
    }

    out = visual_feat_encoder(feats, boxes, params)
    out = jax.block_until_ready(out)

    ref = reference(feats, boxes, params)
    assert out.shape == (B, N, hidden_size)
    # bf16 MXU inputs + bf16 output writeback -> loosened tolerance vs f32 ref.
    assert jnp.allclose(out.astype(jnp.float32), ref, atol=5e-2, rtol=5e-2), \
        "mismatch vs reference"

    print("KERNEL_OK")
</pallas_src>

<mosaic_0001>
module attributes {stable_mosaic.version = 11 : i64} {
  func.func @visual_feat_encoder_kernel(%arg0: i32, %arg1: memref<8x16xf32, #tpu.memory_space<vmem>>, %arg2: memref<8x4xf32, #tpu.memory_space<vmem>>, %arg3: memref<16x32xbf16, #tpu.memory_space<vmem>>, %arg4: memref<4x32xf32, #tpu.memory_space<vmem>>, %arg5: memref<8x32xf32, #tpu.memory_space<vmem>>, %arg6: memref<8x32xbf16, #tpu.memory_space<vmem>>) attributes {dimension_semantics = [#tpu.dimension_semantics<parallel>], iteration_bounds = array<i64: 2>, scalar_prefetch = 0 : i64, scratch_operands = 0 : i64, tpu.core_type = #tpu.core_type<tc>, window_params = [{transform_indices = @transform_0, window_bounds = array<i64: 8, 16>}, {transform_indices = @transform_1, window_bounds = array<i64: 8, 4>}, {pipeline_mode = #tpu.pipeline_mode<synchronous>, transform_indices = @transform_2, window_bounds = array<i64: 16, 32>}, {pipeline_mode = #tpu.pipeline_mode<synchronous>, transform_indices = @transform_3, window_bounds = array<i64: 4, 32>}, {pipeline_mode = #tpu.pipeline_mode<synchronous>, transform_indices = @transform_4, window_bounds = array<i64: 8, 32>}, {transform_indices = @transform_5, window_bounds = array<i64: 8, 32>}]} {
    %c0 = arith.constant 0 : index
    %c0_0 = arith.constant 0 : index
    %0 = vector.load %arg1[%c0, %c0_0] : memref<8x16xf32, #tpu.memory_space<vmem>>, vector<8x16xf32>
    %1 = arith.truncf %0 : vector<8x16xf32> to vector<8x16xbf16>
    %c0_1 = arith.constant 0 : index
    %c0_2 = arith.constant 0 : index
    %2 = vector.load %arg3[%c0_1, %c0_2] : memref<16x32xbf16, #tpu.memory_space<vmem>>, vector<16x32xbf16>
    %cst = arith.constant dense<0.000000e+00> : vector<8x32xf32>
    %3 = tpu.matmul %1, %2, %cst {dimension_numbers = #tpu.dot_dimension_numbers<[1], [0], [0], [1], [0, 0, 1, 1], [], []>} : vector<8x16xbf16>, vector<16x32xbf16>, vector<8x32xf32> -> vector<8x32xf32>
    %c0_3 = arith.constant 0 : index
    %c0_4 = arith.constant 0 : index
    %4 = vector.load %arg5[%c0_3, %c0_4] : memref<8x32xf32, #tpu.memory_space<vmem>>, vector<1x32xf32>
    %5 = vector.broadcast %4 : vector<1x32xf32> to vector<8x32xf32>
    %6 = arith.addf %3, %5 : vector<8x32xf32>
    %c1 = arith.constant 1 : index
    %c0_5 = arith.constant 0 : index
    %7 = vector.load %arg5[%c1, %c0_5] : memref<8x32xf32, #tpu.memory_space<vmem>>, vector<1x32xf32>
    %c2 = arith.constant 2 : index
    %c0_6 = arith.constant 0 : index
    %8 = vector.load %arg5[%c2, %c0_6] : memref<8x32xf32, #tpu.memory_space<vmem>>, vector<1x32xf32>
    %cst_7 = arith.constant dense<0.000000e+00> : vector<8xf32>
    %9 = vector.multi_reduction <add>, %6, %cst_7 [1] : vector<8x32xf32> to vector<8xf32>
    %10 = vector.shape_cast %9 : vector<8xf32> to vector<8x1xf32>
    %11 = arith.mulf %6, %6 : vector<8x32xf32>
    %cst_8 = arith.constant dense<0.000000e+00> : vector<8xf32>
    %12 = vector.multi_reduction <add>, %11, %cst_8 [1] : vector<8x32xf32> to vector<8xf32>
    %13 = vector.shape_cast %12 : vector<8xf32> to vector<8x1xf32>
    %cst_9 = arith.constant 3.125000e-02 : f32
    %14 = vector.broadcast %cst_9 : f32 to vector<8x1xf32>
    %15 = arith.mulf %10, %14 : vector<8x1xf32>
    %cst_10 = arith.constant 3.125000e-02 : f32
    %16 = vector.broadcast %cst_10 : f32 to vector<8x1xf32>
    %17 = arith.mulf %13, %16 : vector<8x1xf32>
    %18 = arith.mulf %15, %15 : vector<8x1xf32>
    %19 = arith.subf %17, %18 : vector<8x1xf32>
    %cst_11 = arith.constant 0.000000e+00 : f32
    %20 = vector.broadcast %cst_11 : f32 to vector<8x1xf32>
    %21 = arith.maximumf %19, %20 : vector<8x1xf32>
    %cst_12 = arith.constant 9.99999971E-10 : f32
    %22 = vector.broadcast %cst_12 : f32 to vector<8x1xf32>
    %23 = arith.addf %21, %22 : vector<8x1xf32>
    %24 = math.rsqrt %23 : vector<8x1xf32>
    %25 = vector.broadcast %15 : vector<8x1xf32> to vector<8x32xf32>
    %26 = arith.subf %6, %25 : vector<8x32xf32>
    %27 = vector.broadcast %24 : vector<8x1xf32> to vector<8x32xf32>
    %28 = vector.broadcast %7 : vector<1x32xf32> to vector<8x32xf32>
    %29 = arith.mulf %27, %28 : vector<8x32xf32>
    %30 = arith.mulf %26, %29 : vector<8x32xf32>
    %31 = vector.broadcast %8 : vector<1x32xf32> to vector<8x32xf32>
    %32 = arith.addf %30, %31 : vector<8x32xf32>
    %c0_13 = arith.constant 0 : index
    %c0_14 = arith.constant 0 : index
    %33 = vector.load %arg2[%c0_13, %c0_14] : memref<8x4xf32, #tpu.memory_space<vmem>>, vector<8x4xf32>
    %34 = vector.extract_strided_slice %33 {offsets = [0, 0], sizes = [8, 1], strides = [1, 1]} : vector<8x4xf32> to vector<8x1xf32>
    %c0_15 = arith.constant 0 : index
    %c0_16 = arith.constant 0 : index
    %35 = vector.load %arg4[%c0_15, %c0_16] : memref<4x32xf32, #tpu.memory_space<vmem>>, vector<1x32xf32>
    %36 = vector.broadcast %34 : vector<8x1xf32> to vector<8x32xf32>
    %37 = vector.broadcast %35 : vector<1x32xf32> to vector<8x32xf32>
    %38 = arith.mulf %36, %37 : vector<8x32xf32>
    %c3 = arith.constant 3 : index
    %c0_17 = arith.constant 0 : index
    %39 = vector.load %arg5[%c3, %c0_17] : memref<8x32xf32, #tpu.memory_space<vmem>>, vector<1x32xf32>
    %40 = vector.broadcast %39 : vector<1x32xf32> to vector<8x32xf32>
    %41 = arith.addf %38, %40 : vector<8x32xf32>
    %42 = vector.extract_strided_slice %33 {offsets = [0, 1], sizes = [8, 1], strides = [1, 1]} : vector<8x4xf32> to vector<8x1xf32>
    %c1_18 = arith.constant 1 : index
    %c0_19 = arith.constant 0 : index
    %43 = vector.load %arg4[%c1_18, %c0_19] : memref<4x32xf32, #tpu.memory_space<vmem>>, vector<1x32xf32>
    %44 = vector.broadcast %42 : vector<8x1xf32> to vector<8x32xf32>
    %45 = vector.broadcast %43 : vector<1x32xf32> to vector<8x32xf32>
    %46 = arith.mulf %44, %45 : vector<8x32xf32>
    %47 = arith.addf %41, %46 : vector<8x32xf32>
    %48 = vector.extract_strided_slice %33 {offsets = [0, 2], sizes = [8, 1], strides = [1, 1]} : vector<8x4xf32> to vector<8x1xf32>
    %c2_20 = arith.constant 2 : index
    %c0_21 = arith.constant 0 : index
    %49 = vector.load %arg4[%c2_20, %c0_21] : memref<4x32xf32, #tpu.memory_space<vmem>>, vector<1x32xf32>
    %50 = vector.broadcast %48 : vector<8x1xf32> to vector<8x32xf32>
    %51 = vector.broadcast %49 : vector<1x32xf32> to vector<8x32xf32>
    %52 = arith.mulf %50, %51 : vector<8x32xf32>
    %53 = arith.addf %47, %52 : vector<8x32xf32>
    %54 = vector.extract_strided_slice %33 {offsets = [0, 3], sizes = [8, 1], strides = [1, 1]} : vector<8x4xf32> to vector<8x1xf32>
    %c3_22 = arith.constant 3 : index
    %c0_23 = arith.constant 0 : index
    %55 = vector.load %arg4[%c3_22, %c0_23] : memref<4x32xf32, #tpu.memory_space<vmem>>, vector<1x32xf32>
    %56 = vector.broadcast %54 : vector<8x1xf32> to vector<8x32xf32>
    %57 = vector.broadcast %55 : vector<1x32xf32> to vector<8x32xf32>
    %58 = arith.mulf %56, %57 : vector<8x32xf32>
    %59 = arith.addf %53, %58 : vector<8x32xf32>
    %c4 = arith.constant 4 : index
    %c0_24 = arith.constant 0 : index
    %60 = vector.load %arg5[%c4, %c0_24] : memref<8x32xf32, #tpu.memory_space<vmem>>, vector<1x32xf32>
    %c5 = arith.constant 5 : index
    %c0_25 = arith.constant 0 : index
    %61 = vector.load %arg5[%c5, %c0_25] : memref<8x32xf32, #tpu.memory_space<vmem>>, vector<1x32xf32>
    %cst_26 = arith.constant dense<0.000000e+00> : vector<8xf32>
    %62 = vector.multi_reduction <add>, %59, %cst_26 [1] : vector<8x32xf32> to vector<8xf32>
    %63 = vector.shape_cast %62 : vector<8xf32> to vector<8x1xf32>
    %64 = arith.mulf %59, %59 : vector<8x32xf32>
    %cst_27 = arith.constant dense<0.000000e+00> : vector<8xf32>
    %65 = vector.multi_reduction <add>, %64, %cst_27 [1] : vector<8x32xf32> to vector<8xf32>
    %66 = vector.shape_cast %65 : vector<8xf32> to vector<8x1xf32>
    %cst_28 = arith.constant 3.125000e-02 : f32
    %67 = vector.broadcast %cst_28 : f32 to vector<8x1xf32>
    %68 = arith.mulf %63, %67 : vector<8x1xf32>
    %cst_29 = arith.constant 3.125000e-02 : f32
    %69 = vector.broadcast %cst_29 : f32 to vector<8x1xf32>
    %70 = arith.mulf %66, %69 : vector<8x1xf32>
    %71 = arith.mulf %68, %68 : vector<8x1xf32>
    %72 = arith.subf %70, %71 : vector<8x1xf32>
    %cst_30 = arith.constant 0.000000e+00 : f32
    %73 = vector.broadcast %cst_30 : f32 to vector<8x1xf32>
    %74 = arith.maximumf %72, %73 : vector<8x1xf32>
    %cst_31 = arith.constant 9.99999971E-10 : f32
    %75 = vector.broadcast %cst_31 : f32 to vector<8x1xf32>
    %76 = arith.addf %74, %75 : vector<8x1xf32>
    %77 = math.rsqrt %76 : vector<8x1xf32>
    %78 = vector.broadcast %68 : vector<8x1xf32> to vector<8x32xf32>
    %79 = arith.subf %59, %78 : vector<8x32xf32>
    %80 = vector.broadcast %77 : vector<8x1xf32> to vector<8x32xf32>
    %81 = vector.broadcast %60 : vector<1x32xf32> to vector<8x32xf32>
    %82 = arith.mulf %80, %81 : vector<8x32xf32>
    %83 = arith.mulf %79, %82 : vector<8x32xf32>
    %84 = vector.broadcast %61 : vector<1x32xf32> to vector<8x32xf32>
    %85 = arith.addf %83, %84 : vector<8x32xf32>
    %86 = arith.addf %32, %85 : vector<8x32xf32>
    %87 = arith.truncf %86 : vector<8x32xf32> to vector<8x32xbf16>
    %c0_32 = arith.constant 0 : index
    %c0_33 = arith.constant 0 : index
    %88 = vector.load %arg6[%c0_32, %c0_33] : memref<8x32xbf16, #tpu.memory_space<vmem>>, vector<8x32xbf16>
    tpu.vector_store %arg6[%c0_32, %c0_33], %87 {strides = array<i32>} : memref<8x32xbf16, #tpu.memory_space<vmem>>, vector<8x32xbf16>,
    return
  }
  func.func @transform_0(%arg0: i32) -> (i32, i32) {
    %c0_i32 = arith.constant 0 : i32
    %c0_i32_0 = arith.constant 0 : i32
    return %arg0, %c0_i32 : i32, i32
  }
  func.func @transform_1(%arg0: i32) -> (i32, i32) {
    %c0_i32 = arith.constant 0 : i32
    %c0_i32_0 = arith.constant 0 : i32
    return %arg0, %c0_i32 : i32, i32
  }
  func.func @transform_2(%arg0: i32) -> (i32, i32) {
    %c0_i32 = arith.constant 0 : i32
    %c0_i32_0 = arith.constant 0 : i32
    %c0_i32_1 = arith.constant 0 : i32
    return %c0_i32, %c0_i32_0 : i32, i32
  }
  func.func @transform_3(%arg0: i32) -> (i32, i32) {
    %c0_i32 = arith.constant 0 : i32
    %c0_i32_0 = arith.constant 0 : i32
    %c0_i32_1 = arith.constant 0 : i32
    return %c0_i32, %c0_i32_0 : i32, i32
  }
  func.func @transform_4(%arg0: i32) -> (i32, i32) {
    %c0_i32 = arith.constant 0 : i32
    %c0_i32_0 = arith.constant 0 : i32
    %c0_i32_1 = arith.constant 0 : i32
    return %c0_i32, %c0_i32_0 : i32, i32
  }
  func.func @transform_5(%arg0: i32) -> (i32, i32) {
    %c0_i32 = arith.constant 0 : i32
    %c0_i32_0 = arith.constant 0 : i32
    return %arg0, %c0_i32 : i32, i32
  }
}

</mosaic_0001>

<bundles_post_ra>
// kernel: tpu_custom_call.1
= control target key start
LH: loop header
LB: loop body
LE: loop exit
PB: predicated region body
PF: predicated region fallthrough
CT: control target
= control target key end

     0   :  { %10 = vsyncpa [#allocation3], 0  ;;  %s918_s0 = inlined_call_operand.vmem [shape: f32[16,16], index: 0, kind: input, shape index: {}]   ;;  %s919_s1 = inlined_call_operand.vmem [shape: f32[16,4], index: 1, kind: input, shape index: {}]   ;;  %s920_s2 = inlined_call_operand.hbm [shape: bf16[16,32], index: 2, kind: input, shape index: {}]   ;;  %s921_s3 = inlined_call_operand.vmem [shape: f32[4,32], index: 3, kind: input, shape index: {}]   ;;  %s922_s4 = inlined_call_operand.hbm [shape: f32[8,32], index: 4, kind: input, shape index: {}]   ;;  %s923_s5 = inlined_call_operand.hbm [shape: bf16[16,32], index: 5, kind: output, shape index: {}]  }
   0x1   :  { %11 = vsyncpa [#allocation6], 0 }
   0x2   :  { %12 = vsyncpa [#allocation4], 0 }
   0x3   :  { %14 = vsyncpa [#allocation4 + $0x1], 0  ;;  %s787_s18 = smov 0   ;;  %s789_s19 = smov 0  }
   0x4   :  { %s791_s20 = smov 0   ;;  %s793_s21 = smov 0  }
   0x5 LB: > { %s808_s22 = sadd.s32 4294967295, %s747_s21   ;;  %s511_s23 = sadd.s32 4294967294, %s747_s21   ;;  %s747_s21 = sphi %s793_s21, %s930_s21   ;;  %s743_s20 = sphi %s791_s20, %s929_s20   ;;  %s739_s19 = sphi %s789_s19, %s928_s19   ;;  %s735_s18 = sphi %s787_s18, %s927_s18  }
   0x6   : > { %s812_s24 = sadd.s32 1, %s747_s21   ;;  %s142_s25 = sadd.s32 1, %s743_s20 }
   0x7   : > { %s139_s26 = ssub.s32 %s747_s21, %s812_s24  ;;  %p152_p0 = scmp.ne.s32.totalorder %s743_s20, %s739_s19 }
   0x8   : > { %p140_p1 = scmp.eq.s32.totalorder %s139_s26, 0  ;;  %p153_p2 = scmp.eq.s32.totalorder %s808_s22, 1 }
   0x9   : > { %p158_p3 = scmp.ne.s32.totalorder %s739_s19, %s735_s18  ;;  %p159_p4 = scmp.eq.s32.totalorder %s511_s23, 1 }
   0xa   : > { %s823_s27 = scalar_select %p140_p1, %s743_s20, %s142_s25  }
   0xb   : > { %p825_p5 = por %p153_p2, %p152_p0  ;;  %p829_p6 = por %p159_p4, %p158_p3 }
   0xc   : > { %p512_p7 = scmp.ge.s32.totalorder %s747_s21, 1  ;;  %p166_p8 = scmp.lt.s32.totalorder %s747_s21, 3 }
   0xd   : > { %p553_p9 = scmp.eq.s32.totalorder %s808_s22, 0  ;;  %s177_s8 = sshll.u32 %s920_s2, 4  ;;  %s178_s8 = int_to_ptr.hbm [resolvable:$true] %s177_s8 }
   0xe   : > { %p836_p10 = pnand %p512_p7, %p166_p8  ;;  %s749_s9 = smov [#allocation2]  }
   0xf   : > { %s179_s10 = sshll.u32 %s749_s9, 4  ;;  %s195_s13 = sshll.u32 %s922_s4, 4  ;;  %s180_s10 = int_to_ptr.vmem [resolvable:$true] %s179_s10  ;;  %s196_s13 = int_to_ptr.hbm [resolvable:$true] %s195_s13 }
  0x10   : > { %p542_p11 = pneg %p836_p10  ;;  %s750_s14 = smov 64  }
  0x11   : > { %s751_s15 = smov 4   ;;  %s752_s16 = smov [#allocation5]  }
  0x12   : > { %p543_p12 = pnand %p553_p9, %p542_p11  ;;  %s197_s17 = sshll.u32 %s752_s16, 4  ;;  %s198_s17 = int_to_ptr.vmem [resolvable:$true] %s197_s17 }
  0x13   : > { %224 = sbr.rel (%p836_p10) target bundleno = 338 (0x152), region = 40 }
  0x14   : > { %545 = dma.hbm_to_vmem [thread:$0]  (!%p543_p12), %s178_s8, 128, %s180_s10, [#allocation3], %s750_s14, %s750_s14, %s751_s15  }
  0x15   : > { %548 = dma.hbm_to_vmem [thread:$0]  (!%p543_p12), %s196_s13, 128, %s198_s17, [#allocation6]  }
  0x18   : > { %722 = dma.done.wait (%p553_p9), [#allocation3], 128  }
  0x19   : > { %724 = vsyncadd (%p553_p9), [#allocation3], 4294967168 }
  0x1a   : > { %726 = dma.done.wait (%p553_p9), [#allocation6], 128  }
  0x1b   : > { %728 = vsyncadd (%p553_p9), [#allocation6], 4294967168  ;;  %p261_p13 = scmp.lt.s32.totalorder %s808_s22, 1  ;;  %v753_v0 = vmov 0   ;;  %v754_v1 = vmov 2   ;;  %v531_v3 = vld [vmem:[#allocation2] sm:$0xff] }
  0x1c   : > { %598 = vset.pattern.permute.xlu0 %v753_v0  ;;  %600 = vset.pattern.permute.xlu1 %v754_v1  ;;  %vm282_vm0 = vcmask 130048   ;;  %v755_v6 = vmov 1   ;;  %v756_v7 = vmov 3   ;;  %v603_v10 = vld [vmem:[%s921_s3] ss:$0 sm:$0xff]  ;;  %vm301_vm1 = vcmask 261120  }
  0x1d   : > { %s262_s23 = scalar_select %p261_p13, %s808_s22, 1  ;;  %293 = vmatpush.bf16.msra.mxu0 %v531_v3  ;;  %v604_v11 = vld [vmem:[#allocation5 + $0x3] ss:$0 sm:$0xff]  ;;  %v606_v13 = vld [vmem:[%s921_s3 + $0x1] ss:$0 sm:$0xff]  ;;  %vm400_vm8 = vcmask 257024  }
  0x1e   : > { %v605_v14 = vld [vmem:[%s921_s3 + $0x2] ss:$0 sm:$0xff]  ;;  %v607_v15 = vld [vmem:[%s921_s3 + $0x3] ss:$0 sm:$0xff]  ;;  %v608_v23 = vld [vmem:[#allocation5] ss:$0 sm:$0xff] }
  0x1f   : > { %s520_s25 = sshll.u32 %s262_s23, 3  ;;  %v609_v60 = vld [vmem:[#allocation5 + $0x1] ss:$0 sm:$0xff]  ;;  %v611_v1 = vld [vmem:[#allocation5 + $0x4] ss:$0 sm:$0xff]  ;;  %s258_s23 = sand.u32 1, %s739_s19  }
  0x20   : > { %s268_s6 = scalar_lea.vmem %s919_s1, %s520_s25  ;;  %s264_s9 = scalar_lea.vmem %s918_s0, %s520_s25 }
  0x21   : > { %v331_v2 = vld [vmem:[%s268_s6] sm:$0xff]  ;;  %s519_s25 = sshll.u32 %s258_s23, 2  ;;  %s528_s26 = sshll.u32 %s808_s22, 2 }
  0x22   : > { %v270_v4 = vld [vmem:[%s264_s9] sm:$0xff]  ;;  %335 = vperm.xlu0 %598, %v331_v2   ;;  %353 = vperm.xlu1 %600, %v331_v2   ;;  %s413_s7 = scalar_lea.hbm %s923_s5, %s528_s26  ;;  %s260_s8 = scalar_lea.vmem [#allocation7], %s519_s25 }
  0x23   : > { %v271_v5 = vpack.c.bf16 %v270_v4, %v270_v4  ;;  %s415_s9 = sshll.u32 %s260_s8, 4  ;;  %s417_s10 = sshll.u32 %s413_s7, 4  ;;  %s416_s9 = int_to_ptr.vmem [resolvable:$true] %s415_s9  ;;  %s418_s10 = int_to_ptr.hbm [resolvable:$true] %s417_s10 }
  0x24   : > { %s403_s22 = scalar_lea.sflag [#allocation4], %s258_s23  ;;  %s691_s11 = sshra.s32 %s418_s10, 4  ;;  %s692_s11 = int_to_ptr.hbm [resolvable:$true] %s691_s11 }
  0x25   : > { %526 = vmatmul.msk.bf16.vlgmr.msra.gmra.mxu0 %vm282_vm0, %v271_v5  ;;  %s693_s12 = scalar_lea.hbm %s692_s11, 4  ;;  %s697_s15 = scalar_lea.hbm %s923_s5, 8 }
  0x26   : > { %p694_p0 = scmp.ne.s32.totalorder %s692_s11, %s693_s12  ;;  %p698_p3 = scmp.lt.s32.totalorder %s692_s11, %s923_s5 }
  0x27   : > { %p699_p4 = scmp.lt.s32.totalorder %s697_s15, %s693_s12 }
  0x28   : > { %p695_p1 = pnand %p694_p0, %p825_p5 }
  0x29   : > { %p700_p7 = por %p699_p4, %p698_p3 }
  0x2a   : > { %599 = vset.pattern.permute.xlu0 %v755_v6  ;;  %601 = vset.pattern.permute.xlu1 %v756_v7  ;;  %v610_v6 = vld [vmem:[#allocation5 + $0x2] ss:$0 sm:$0xff]  ;;  %p696_p2 = pneg %p695_p1 }
  0x2b   : > { %345 = vperm.xlu0 %599, %v331_v2   ;;  %361 = vperm.xlu1 %601, %v331_v2  }
  0x2c   : > { %p701_p8 = pnand %p700_p7, %p696_p2 }
  0x33   : > { %602 = vset.pattern.permute.xlu0 %v756_v7 }
  0x94   : > { %v336_v8 = vpop.permute.xlu0 %335  ;;  %v354_v9 = vpop.permute.xlu1 %353 }
  0x95   : > { %v339_v12 = vmul.f32 %v603_v10, %v336_v8  ;;  %v357_v20 = vmul.f32 %v605_v14, %v354_v9  ;;  %v612_v8 = vld [vmem:[#allocation5 + $0x5] ss:$0 sm:$0xff] }
  0x97   : > { %v342_v18 = vadd.f32 %v604_v11, %v339_v12 }
  0x9d   : > { %v346_v16 = vpop.permute.xlu0 %345  ;;  %v362_v17 = vpop.permute.xlu1 %361 }
  0x9e   : > { %v349_v19 = vmul.f32 %v606_v13, %v346_v16  ;;  %v365_v22 = vmul.f32 %v607_v15, %v362_v17 }
  0xa0   : > { %v350_v21 = vadd.f32 %v349_v19, %v342_v18 }
  0xa2   : > { %v358_v24 = vadd.f32 %v357_v20, %v350_v21  ;;  %v295_v25 = vpop.f32.mrf.mxu0 }
  0xa3   : > { %v296_v27 = vadd.f32 %v608_v23, %v295_v25 }
  0xa4   : > { %v880_v26 = vadd.f32 %v365_v22, %v358_v24 }
  0xa5   : > { %v305_v29 = vmul.f32 %v296_v27, %v296_v27  ;;  %v302_v32 = vsel %vm301_vm1, %v296_v27, 0.0 }
  0xa6   : > { %v369_v28 = vsel %vm301_vm1, %v880_v26, 0.0  ;;  %v372_v33 = vmul.f32 %v880_v26, %v880_v26 }
  0xa7   : > { %370 = vadd.xlane.f32.xlu2 %v369_v28  ;;  %v306_v30 = vsel %vm301_vm1, %v305_v29, 0.0 }
  0xa8   : > { %307 = vadd.xlane.f32.xlu1 %v306_v30  ;;  %v373_v34 = vsel %vm301_vm1, %v372_v33, 0.0 }
  0xaa   : > { %v297_v31 = vpop.f32.mrf.mxu0 }
  0xaf   : > { %303 = vadd.xlane.f32.xlu2 %v302_v32 }
  0xb7   : > { %374 = vadd.xlane.f32.xlu2 %v373_v34 }
 0x11a   : > { %v371_v35 = vpop.xlane.xlu2 %370 }
 0x11b   : > { %v308_v36 = vpop.xlane.xlu1 %307  ;;  %v376_v41 = vmul.f32 0.03125, %v371_v35 }
 0x11c   : > { %v310_v39 = vmul.f32 0.03125, %v308_v36 }
 0x11d   : > { %v378_v45 = vmul.f32 %v376_v41, %v376_v41  ;;  %v392_v5 = vsub.f32 %v880_v26, %v376_v41 }
 0x122   : > { %v304_v37 = vpop.xlane.xlu2 %303 }
 0x123   : > { %v309_v38 = vmul.f32 0.03125, %v304_v37 }
 0x125   : > { %v311_v40 = vmul.f32 %v309_v38, %v309_v38  ;;  %v325_v3 = vsub.f32 %v296_v27, %v309_v38 }
 0x127   : > { %v312_v42 = vsub.f32 %v310_v39, %v311_v40 }
 0x129   : > { %v313_v43 = vmax.f32 %v312_v42, 0.0 }
 0x12a   : > { %v375_v44 = vpop.xlane.xlu2 %374 }
 0x12b   : > { %v314_v46 = vadd.f32 1e-09, %v313_v43  ;;  %v377_v47 = vmul.f32 0.03125, %v375_v44 }
 0x12d   : > { %613 = vrsqrt.f32 %v314_v46  ;;  %v379_v48 = vsub.f32 %v377_v47, %v378_v45  ;;  %vm321_vm3 = vweird.f32 %v314_v46 }
 0x12f   : > { %v380_v49 = vmax.f32 %v379_v48, 0.0 }
 0x131   : > { %v381_v50 = vadd.f32 1e-09, %v380_v49 }
 0x133   : > { %v614_v51 = vpop.eup %613  ;;  %615 = vrsqrt.f32 %v381_v50  ;;  %vm388_vm6 = vweird.f32 %v381_v50 }
 0x134   : > { %v316_v52 = vmul.f32 %v614_v51, %v314_v46  ;;  %vm322_vm2 = vweird.f32 %v614_v51 }
 0x135   : > { %vm323_vm4 = vmor %vm321_vm3, %vm322_vm2 }
 0x136   : > { %v317_v53 = vmul.f32 %v614_v51, %v316_v52 }
 0x138   : > { %v318_v54 = vmul.f32 0.5, %v317_v53 }
 0x139   : > { %v616_v55 = vpop.eup %615 }
 0x13a   : > { %v319_v56 = vsub.f32 1.5, %v318_v54  ;;  %v383_v57 = vmul.f32 %v616_v55, %v381_v50  ;;  %vm389_vm5 = vweird.f32 %v616_v55 }
 0x13b   : > { %vm390_vm7 = vmor %vm388_vm6, %vm389_vm5 }
 0x13c   : > { %v320_v58 = vmul.f32 %v614_v51, %v319_v56  ;;  %v384_v59 = vmul.f32 %v616_v55, %v383_v57 }
 0x13e   : > { %v324_v61 = vsel %vm323_vm4, %v614_v51, %v320_v58  ;;  %v385_v62 = vmul.f32 0.5, %v384_v59 }
 0x13f   : > { %v327_v0 = vmul.f32 %v609_v60, %v324_v61 }
 0x140   : > { %v386_v63 = vsub.f32 1.5, %v385_v62 }
 0x141   : > { %v328_v7 = vmul.f32 %v327_v0, %v325_v3 }
 0x142   : > { %v387_v2 = vmul.f32 %v616_v55, %v386_v63 }
 0x143   : > { %v330_v11 = vadd.f32 %v610_v6, %v328_v7 }
 0x144   : > { %v391_v4 = vsel %vm390_vm7, %v616_v55, %v387_v2 }
 0x145   : > { %v394_v9 = vmul.f32 %v611_v1, %v391_v4 }
 0x147   : > { %v395_v10 = vmul.f32 %v394_v9, %v392_v5 }
 0x149   : > { %v397_v12 = vadd.f32 %v612_v8, %v395_v10 }
 0x14b   : > { %v398_v13 = vadd.f32 %v397_v12, %v330_v11 }
 0x14d   : > { %v399_v14 = vpack.c.bf16 %v398_v13, %v398_v13 }
 0x14f   : > { %401 = vst.msk [vmem:[%s260_s8] sm:$0xf] %vm400_vm8, %v399_v14 }
 0x150   : > { %704 = shalt.err (!%p701_p8)
}
 0x151   : > { %540 = dma.vmem_to_hbm [thread:$0]  (%p825_p5), %s416_s9, 64, %s418_s10, %s403_s22  }
 0x152 PF: > { %p557_p9 = scmp.ge.s32.totalorder %s747_s21, 2  ;;  %s429_s23 = sand.u32 1, %s735_s18  }
 0x153   : > { %s430_s25 = scalar_lea.sflag [#allocation4], %s429_s23 }
 0x154   : > { %p550_p10 = pnand %p557_p9, %p829_p6 }
 0x156   : > { %p551_p11 = pneg %p550_p10 }
 0x158   : > { %730 = dma.done.wait (%p551_p11), %s430_s25, 64  }
 0x159   : > { %732 = vsyncadd (%p551_p11), %s430_s25, 4294967232  ;;  %p17_p12 = scmp.ge.s32.totalorder %s812_s24, 4   ;;  %s927_s18 = smov %s739_s19 }
 0x15a   : > { %s928_s19 = smov %s743_s20  ;;  %s929_s20 = smov %s823_s27 }
 0x15b   : > { %s930_s21 = smov %s812_s24  ;;  %19 = sbr.rel (!%p17_p12) target bundleno = 5 (0x5), region = 87 }
 0x160   :  { %436 = vsyncpa [#allocation3], 1 }
 0x161   :  { %438 = vsyncpa [#allocation3 + $0x1], 1 }
 0x162   :  { %439 = vsyncpa [#allocation6], 1 }
 0x163   :  { %440 = vsyncpa [#allocation4], 1 }
 0x164   :  { %442 = vsyncpa [#allocation4 + $0x1], 1 }

</bundles_post_ra>
